<compile_context>
chip_gen: v5e
topology: v5e:2x2
jax: 0.10.0
libtpu: 0.0.40
codegen_flags: <defaults>
</compile_context>

<pallas_src>
import functools

import jax
import jax.numpy as jnp
from jax.experimental import pallas as pl
from jax.experimental.pallas import tpu as pltpu


def _upsample_conv_kernel(xf_ref, mask_ref, w_ref, b_ref, o_ref, im2col_ref,
                          *, H, W):
    """One image per grid step.

    xf_ref    : (1, Cin, (H+2)*W + 2)  row-halo-padded image, spatial dims
                flattened, plus one guard element at each end of the flat axis.
    mask_ref  : (2, H*W)   column-edge masks ([0]: zero col j==0, [1]: j==W-1).
    w_ref     : (4*Cout, 9*Cin)  phase-folded weights (upsample folded in).
    b_ref     : (4*Cout, 1)      bias, f32.
    o_ref     : (1, 4*Cout, H*W) per-phase outputs, f32, lane axis = H*W.
    im2col_ref: (9*Cin, H*W)     VMEM scratch holding the 9 shifted taps.
    """
    C = xf_ref.shape[1]
    HW = H * W

    # Build the im2col slab: tap (r, c) is the original image shifted by
    # (r-1, c-1) with zero padding, flattened to (Cin, H*W).  Row shifts are
    # contiguous lane slices of the flattened row-padded image; the +/-1
    # column shifts wrap across rows, so their edge column is zeroed by mask.
    for r in range(3):
        for c in range(3):
            start = r * W + c                      # == 1 + r*W + (c - 1)
            tap = xf_ref[0, :, start:start + HW]   # (Cin, H*W)
            if c == 0:
                tap = tap * mask_ref[0:1, :]
            elif c == 2:
                tap = tap * mask_ref[1:2, :]
            slot = r * 3 + c
            im2col_ref[slot * C:(slot + 1) * C, :] = tap

    # One MXU matmul: all 4 output phases x all 9 taps at once, f32 accumulation.
    acc = jnp.dot(w_ref[...], im2col_ref[...],
                  preferred_element_type=jnp.float32)       # (4*Cout, H*W)
    o_ref[0] = (acc + b_ref[...]).astype(o_ref.dtype)


def _fold_upsample_into_weights(w_oihw):
    """Fold nearest-2x upsample + 3x3 'same' conv into 4 phase-specific 3x3
    convs on the ORIGINAL image, packed as a single (4*Cout, 9*Cin) matmul LHS.

    Row index = (2*py + px) * Cout + co
    K index   = (r * 3 + s) * Cin + ci, where (r-1, s-1) is the tap offset on
                the original image.
    """
    Cout, Cin, KH, KW = w_oihw.shape
    assert (KH, KW) == (3, 3), "kernel must be 3x3"
    # G[phase, r, kh] = 1 iff conv row kh reads original-row offset (r-1) for
    # output rows of parity `phase`:  floor((phase + kh - 1) / 2) == r - 1.
    G = jnp.array(
        [[[1.0, 0.0, 0.0],
          [0.0, 1.0, 1.0],
          [0.0, 0.0, 0.0]],
         [[0.0, 0.0, 0.0],
          [1.0, 1.0, 0.0],
          [0.0, 0.0, 1.0]]], dtype=jnp.float32)
    wf = jnp.einsum("prk,qsl,oikl->pqorsi", G, G, w_oihw.astype(jnp.float32))
    return wf.reshape(4 * Cout, 9 * Cin)


def upsample_forward(x_nchw, w_oihw, b, *, compute_dtype=jnp.bfloat16):
    """nearest-2x upsample + Conv2d(Cin, Cout, 3, stride=1, padding=1).

    x_nchw: (N, Cin, H, W) f32;  w_oihw: (Cout, Cin, 3, 3);  b: (Cout,)
    returns (N, Cout, 2H, 2W) f32.
    """
    N, C, H, W = x_nchw.shape
    Cout = w_oihw.shape[0]
    HW = H * W
    Lp = (H + 2) * W + 2     # row-halo-padded, flattened, +1 guard on each end

    # ---- cheap wrapper glue (no 4x upsampled tensor, no layout transposes) ----
    xr = jnp.pad(x_nchw.astype(compute_dtype), ((0, 0), (0, 0), (1, 1), (0, 0)))
    xf = jnp.pad(xr.reshape(N, C, (H + 2) * W), ((0, 0), (0, 0), (1, 1)))

    col = jnp.arange(HW, dtype=jnp.int32) % W
    mask = jnp.stack([col != 0, col != W - 1]).astype(compute_dtype)  # (2, HW)

    wmat = _fold_upsample_into_weights(w_oihw).astype(compute_dtype)  # (4Co,9Ci)
    bmat = jnp.tile(b.astype(jnp.float32), 4).reshape(4 * Cout, 1)

    kernel = functools.partial(_upsample_conv_kernel, H=H, W=W)

    out_ph = pl.pallas_call(
        kernel,
        out_shape=jax.ShapeDtypeStruct((N, 4 * Cout, HW), jnp.float32),
        grid_spec=pltpu.PrefetchScalarGridSpec(
            num_scalar_prefetch=0,
            grid=(N,),
            in_specs=[
                pl.BlockSpec((1, C, Lp), lambda n: (n, 0, 0)),
                pl.BlockSpec((2, HW), lambda n: (0, 0)),
                pl.BlockSpec((4 * Cout, 9 * C), lambda n: (0, 0)),
                pl.BlockSpec((4 * Cout, 1), lambda n: (0, 0)),
            ],
            out_specs=pl.BlockSpec((1, 4 * Cout, HW), lambda n: (n, 0, 0)),
            scratch_shapes=[pltpu.VMEM((9 * C, HW), compute_dtype)],
        ),
        compiler_params=pltpu.CompilerParams(
            dimension_semantics=("parallel",),
            vmem_limit_bytes=32 * 1024 * 1024,
        ),
    )(xf, mask, wmat, bmat)

    # Interleave the 4 phases back:
    # (n, (py,px,co), i*W+j)  ->  (n, co, 2i+py, 2j+px)
    o = out_ph.reshape(N, 2, 2, Cout, H, W)
    o = jnp.transpose(o, (0, 3, 4, 1, 5, 2))
    return o.reshape(N, Cout, 2 * H, 2 * W)


def _reference(x_nchw, w_oihw, b):
    """Pure-JAX reference: nearest 2x upsample then 3x3 'same' conv (NCHW)."""
    up = jnp.repeat(jnp.repeat(x_nchw, 2, axis=2), 2, axis=3)
    out = jax.lax.conv_general_dilated(
        up, w_oihw,
        window_strides=(1, 1),
        padding=((1, 1), (1, 1)),
        dimension_numbers=("NCHW", "OIHW", "NCHW"),
        precision=jax.lax.Precision.HIGHEST,
    )
    return out + b[None, :, None, None]


if __name__ == "__main__":
    N, C, H, W = 2, 4, 16, 16

    key = jax.random.PRNGKey(0)
    kx, kw, kb = jax.random.split(key, 3)
    x = jax.random.normal(kx, (N, C, H, W), dtype=jnp.float32)
    # Deterministic synthetic parameters (nn.Conv2d(C, C, 3) shapes, OIHW layout)
    fan_in = C * 3 * 3
    bound = 1.0 / (fan_in ** 0.5)
    w = jax.random.uniform(kw, (C, C, 3, 3), dtype=jnp.float32,
                           minval=-bound, maxval=bound)
    b = jax.random.uniform(kb, (C,), dtype=jnp.float32,
                           minval=-bound, maxval=bound)

    ref = _reference(x, w, b)

    # 1) f32 path: tight functional check of the upsample->phase-weight folding
    #    and the phase interleave (catches any off-by-one-pixel phase bug).
    out_f32 = jax.block_until_ready(
        upsample_forward(x, w, b, compute_dtype=jnp.float32))
    assert out_f32.shape == (N, C, 2 * H, 2 * W), out_f32.shape
    assert jnp.allclose(out_f32, ref, atol=5e-3, rtol=5e-3), (
        float(jnp.max(jnp.abs(out_f32 - ref))))

    # 2) default bf16 fast path (f32 accumulation): compare against the same
    #    reference on bf16-quantized activations; residual error is only the
    #    bf16 rounding of the folded weights.
    out = jax.block_until_ready(upsample_forward(x, w, b))
    ref_q = _reference(x.astype(jnp.bfloat16).astype(jnp.float32), w, b)
    assert out.shape == (N, C, 2 * H, 2 * W), out.shape
    assert jnp.allclose(out, ref_q, atol=1e-2, rtol=1e-2), (
        float(jnp.max(jnp.abs(out - ref_q))))

    print("KERNEL_OK")
</pallas_src>

<mosaic_0001>
module attributes {stable_mosaic.version = 11 : i64} {
  func.func @_upsample_conv_kernel(%arg0: i32, %arg1: memref<1x4x290xf32, #tpu.memory_space<vmem>>, %arg2: memref<2x256xf32, #tpu.memory_space<vmem>>, %arg3: memref<16x36xf32, #tpu.memory_space<vmem>>, %arg4: memref<16x1xf32, #tpu.memory_space<vmem>>, %arg5: memref<1x16x256xf32, #tpu.memory_space<vmem>>, %arg6: memref<36x256xf32, #tpu.memory_space<vmem>>) attributes {dimension_semantics = [#tpu.dimension_semantics<parallel>], iteration_bounds = array<i64: 2>, scalar_prefetch = 0 : i64, scratch_operands = 1 : i64, tpu.core_type = #tpu.core_type<tc>, window_params = [{transform_indices = @transform_0, window_bounds = array<i64: 1, 4, 290>}, {pipeline_mode = #tpu.pipeline_mode<synchronous>, transform_indices = @transform_1, window_bounds = array<i64: 2, 256>}, {pipeline_mode = #tpu.pipeline_mode<synchronous>, transform_indices = @transform_2, window_bounds = array<i64: 16, 36>}, {pipeline_mode = #tpu.pipeline_mode<synchronous>, transform_indices = @transform_3, window_bounds = array<i64: 16, 1>}, {transform_indices = @transform_4, window_bounds = array<i64: 1, 16, 256>}]} {
    %c0 = arith.constant 0 : index
    %c0_0 = arith.constant 0 : index
    %c0_1 = arith.constant 0 : index
    %0 = vector.load %arg1[%c0, %c0_0, %c0_1] : memref<1x4x290xf32, #tpu.memory_space<vmem>>, vector<1x4x256xf32>
    %1 = vector.shape_cast %0 : vector<1x4x256xf32> to vector<4x256xf32>
    %c0_2 = arith.constant 0 : index
    %c0_3 = arith.constant 0 : index
    %2 = vector.load %arg2[%c0_2, %c0_3] : memref<2x256xf32, #tpu.memory_space<vmem>>, vector<1x256xf32>
    %3 = vector.broadcast %2 : vector<1x256xf32> to vector<4x256xf32>
    %4 = arith.mulf %1, %3 : vector<4x256xf32>
    %c0_4 = arith.constant 0 : index
    %c0_5 = arith.constant 0 : index
    %5 = vector.load %arg6[%c0_4, %c0_5] : memref<36x256xf32, #tpu.memory_space<vmem>>, vector<4x256xf32>
    tpu.vector_store %arg6[%c0_4, %c0_5], %4 {strides = array<i32>} : memref<36x256xf32, #tpu.memory_space<vmem>>, vector<4x256xf32>,
    %c0_6 = arith.constant 0 : index
    %c0_7 = arith.constant 0 : index
    %c1 = arith.constant 1 : index
    %6 = vector.load %arg1[%c0_6, %c0_7, %c1] : memref<1x4x290xf32, #tpu.memory_space<vmem>>, vector<1x4x256xf32>
    %7 = vector.shape_cast %6 : vector<1x4x256xf32> to vector<4x256xf32>
    %c4 = arith.constant 4 : index
    %c0_8 = arith.constant 0 : index
    %8 = vector.load %arg6[%c4, %c0_8] : memref<36x256xf32, #tpu.memory_space<vmem>>, vector<4x256xf32>
    tpu.vector_store %arg6[%c4, %c0_8], %7 {strides = array<i32>} : memref<36x256xf32, #tpu.memory_space<vmem>>, vector<4x256xf32>,
    %c0_9 = arith.constant 0 : index
    %c0_10 = arith.constant 0 : index
    %c2 = arith.constant 2 : index
    %9 = vector.load %arg1[%c0_9, %c0_10, %c2] : memref<1x4x290xf32, #tpu.memory_space<vmem>>, vector<1x4x256xf32>
    %10 = vector.shape_cast %9 : vector<1x4x256xf32> to vector<4x256xf32>
    %c1_11 = arith.constant 1 : index
    %c0_12 = arith.constant 0 : index
    %11 = vector.load %arg2[%c1_11, %c0_12] : memref<2x256xf32, #tpu.memory_space<vmem>>, vector<1x256xf32>
    %12 = vector.broadcast %11 : vector<1x256xf32> to vector<4x256xf32>
    %13 = arith.mulf %10, %12 : vector<4x256xf32>
    %c8 = arith.constant 8 : index
    %c0_13 = arith.constant 0 : index
    %14 = vector.load %arg6[%c8, %c0_13] : memref<36x256xf32, #tpu.memory_space<vmem>>, vector<4x256xf32>
    tpu.vector_store %arg6[%c8, %c0_13], %13 {strides = array<i32>} : memref<36x256xf32, #tpu.memory_space<vmem>>, vector<4x256xf32>,
    %c0_14 = arith.constant 0 : index
    %c0_15 = arith.constant 0 : index
    %c16 = arith.constant 16 : index
    %15 = vector.load %arg1[%c0_14, %c0_15, %c16] : memref<1x4x290xf32, #tpu.memory_space<vmem>>, vector<1x4x256xf32>
    %16 = vector.shape_cast %15 : vector<1x4x256xf32> to vector<4x256xf32>
    %c0_16 = arith.constant 0 : index
    %c0_17 = arith.constant 0 : index
    %17 = vector.load %arg2[%c0_16, %c0_17] : memref<2x256xf32, #tpu.memory_space<vmem>>, vector<1x256xf32>
    %18 = vector.broadcast %17 : vector<1x256xf32> to vector<4x256xf32>
    %19 = arith.mulf %16, %18 : vector<4x256xf32>
    %c12 = arith.constant 12 : index
    %c0_18 = arith.constant 0 : index
    %20 = vector.load %arg6[%c12, %c0_18] : memref<36x256xf32, #tpu.memory_space<vmem>>, vector<4x256xf32>
    tpu.vector_store %arg6[%c12, %c0_18], %19 {strides = array<i32>} : memref<36x256xf32, #tpu.memory_space<vmem>>, vector<4x256xf32>,
    %c0_19 = arith.constant 0 : index
    %c0_20 = arith.constant 0 : index
    %c17 = arith.constant 17 : index
    %21 = vector.load %arg1[%c0_19, %c0_20, %c17] : memref<1x4x290xf32, #tpu.memory_space<vmem>>, vector<1x4x256xf32>
    %22 = vector.shape_cast %21 : vector<1x4x256xf32> to vector<4x256xf32>
    %c16_21 = arith.constant 16 : index
    %c0_22 = arith.constant 0 : index
    %23 = vector.load %arg6[%c16_21, %c0_22] : memref<36x256xf32, #tpu.memory_space<vmem>>, vector<4x256xf32>
    tpu.vector_store %arg6[%c16_21, %c0_22], %22 {strides = array<i32>} : memref<36x256xf32, #tpu.memory_space<vmem>>, vector<4x256xf32>,
    %c0_23 = arith.constant 0 : index
    %c0_24 = arith.constant 0 : index
    %c18 = arith.constant 18 : index
    %24 = vector.load %arg1[%c0_23, %c0_24, %c18] : memref<1x4x290xf32, #tpu.memory_space<vmem>>, vector<1x4x256xf32>
    %25 = vector.shape_cast %24 : vector<1x4x256xf32> to vector<4x256xf32>
    %c1_25 = arith.constant 1 : index
    %c0_26 = arith.constant 0 : index
    %26 = vector.load %arg2[%c1_25, %c0_26] : memref<2x256xf32, #tpu.memory_space<vmem>>, vector<1x256xf32>
    %27 = vector.broadcast %26 : vector<1x256xf32> to vector<4x256xf32>
    %28 = arith.mulf %25, %27 : vector<4x256xf32>
    %c20 = arith.constant 20 : index
    %c0_27 = arith.constant 0 : index
    %29 = vector.load %arg6[%c20, %c0_27] : memref<36x256xf32, #tpu.memory_space<vmem>>, vector<4x256xf32>
    tpu.vector_store %arg6[%c20, %c0_27], %28 {strides = array<i32>} : memref<36x256xf32, #tpu.memory_space<vmem>>, vector<4x256xf32>,
    %c0_28 = arith.constant 0 : index
    %c0_29 = arith.constant 0 : index
    %c32 = arith.constant 32 : index
    %30 = vector.load %arg1[%c0_28, %c0_29, %c32] : memref<1x4x290xf32, #tpu.memory_space<vmem>>, vector<1x4x256xf32>
    %31 = vector.shape_cast %30 : vector<1x4x256xf32> to vector<4x256xf32>
    %c0_30 = arith.constant 0 : index
    %c0_31 = arith.constant 0 : index
    %32 = vector.load %arg2[%c0_30, %c0_31] : memref<2x256xf32, #tpu.memory_space<vmem>>, vector<1x256xf32>
    %33 = vector.broadcast %32 : vector<1x256xf32> to vector<4x256xf32>
    %34 = arith.mulf %31, %33 : vector<4x256xf32>
    %c24 = arith.constant 24 : index
    %c0_32 = arith.constant 0 : index
    %35 = vector.load %arg6[%c24, %c0_32] : memref<36x256xf32, #tpu.memory_space<vmem>>, vector<4x256xf32>
    tpu.vector_store %arg6[%c24, %c0_32], %34 {strides = array<i32>} : memref<36x256xf32, #tpu.memory_space<vmem>>, vector<4x256xf32>,
    %c0_33 = arith.constant 0 : index
    %c0_34 = arith.constant 0 : index
    %c33 = arith.constant 33 : index
    %36 = vector.load %arg1[%c0_33, %c0_34, %c33] : memref<1x4x290xf32, #tpu.memory_space<vmem>>, vector<1x4x256xf32>
    %37 = vector.shape_cast %36 : vector<1x4x256xf32> to vector<4x256xf32>
    %c28 = arith.constant 28 : index
    %c0_35 = arith.constant 0 : index
    %38 = vector.load %arg6[%c28, %c0_35] : memref<36x256xf32, #tpu.memory_space<vmem>>, vector<4x256xf32>
    tpu.vector_store %arg6[%c28, %c0_35], %37 {strides = array<i32>} : memref<36x256xf32, #tpu.memory_space<vmem>>, vector<4x256xf32>,
    %c0_36 = arith.constant 0 : index
    %c0_37 = arith.constant 0 : index
    %c34 = arith.constant 34 : index
    %39 = vector.load %arg1[%c0_36, %c0_37, %c34] : memref<1x4x290xf32, #tpu.memory_space<vmem>>, vector<1x4x256xf32>
    %40 = vector.shape_cast %39 : vector<1x4x256xf32> to vector<4x256xf32>
    %c1_38 = arith.constant 1 : index
    %c0_39 = arith.constant 0 : index
    %41 = vector.load %arg2[%c1_38, %c0_39] : memref<2x256xf32, #tpu.memory_space<vmem>>, vector<1x256xf32>
    %42 = vector.broadcast %41 : vector<1x256xf32> to vector<4x256xf32>
    %43 = arith.mulf %40, %42 : vector<4x256xf32>
    %c32_40 = arith.constant 32 : index
    %c0_41 = arith.constant 0 : index
    %44 = vector.load %arg6[%c32_40, %c0_41] : memref<36x256xf32, #tpu.memory_space<vmem>>, vector<4x256xf32>
    tpu.vector_store %arg6[%c32_40, %c0_41], %43 {strides = array<i32>} : memref<36x256xf32, #tpu.memory_space<vmem>>, vector<4x256xf32>,
    %c0_42 = arith.constant 0 : index
    %c0_43 = arith.constant 0 : index
    %45 = vector.load %arg3[%c0_42, %c0_43] : memref<16x36xf32, #tpu.memory_space<vmem>>, vector<16x36xf32>
    %c0_44 = arith.constant 0 : index
    %c0_45 = arith.constant 0 : index
    %46 = vector.load %arg6[%c0_44, %c0_45] : memref<36x256xf32, #tpu.memory_space<vmem>>, vector<36x256xf32>
    %cst = arith.constant dense<0.000000e+00> : vector<16x256xf32>
    %47 = tpu.matmul %45, %46, %cst {dimension_numbers = #tpu.dot_dimension_numbers<[1], [0], [0], [1], [0, 0, 1, 1], [], []>} : vector<16x36xf32>, vector<36x256xf32>, vector<16x256xf32> -> vector<16x256xf32>
    %c0_46 = arith.constant 0 : index
    %c0_47 = arith.constant 0 : index
    %48 = vector.load %arg4[%c0_46, %c0_47] : memref<16x1xf32, #tpu.memory_space<vmem>>, vector<16x1xf32>
    %49 = vector.broadcast %48 : vector<16x1xf32> to vector<16x256xf32>
    %50 = arith.addf %47, %49 : vector<16x256xf32>
    %c0_48 = arith.constant 0 : index
    %c0_49 = arith.constant 0 : index
    %c0_50 = arith.constant 0 : index
    %51 = vector.load %arg5[%c0_48, %c0_49, %c0_50] : memref<1x16x256xf32, #tpu.memory_space<vmem>>, vector<1x16x256xf32>
    %52 = vector.shape_cast %51 : vector<1x16x256xf32> to vector<16x256xf32>
    %53 = vector.shape_cast %50 : vector<16x256xf32> to vector<1x16x256xf32>
    tpu.vector_store %arg5[%c0_48, %c0_49, %c0_50], %53 {strides = array<i32>} : memref<1x16x256xf32, #tpu.memory_space<vmem>>, vector<1x16x256xf32>,
    return
  }
  func.func @transform_0(%arg0: i32) -> (i32, i32, i32) {
    %c0_i32 = arith.constant 0 : i32
    %c0_i32_0 = arith.constant 0 : i32
    %c0_i32_1 = arith.constant 0 : i32
    return %arg0, %c0_i32, %c0_i32_0 : i32, i32, i32
  }
  func.func @transform_1(%arg0: i32) -> (i32, i32) {
    %c0_i32 = arith.constant 0 : i32
    %c0_i32_0 = arith.constant 0 : i32
    %c0_i32_1 = arith.constant 0 : i32
    return %c0_i32, %c0_i32_0 : i32, i32
  }
  func.func @transform_2(%arg0: i32) -> (i32, i32) {
    %c0_i32 = arith.constant 0 : i32
    %c0_i32_0 = arith.constant 0 : i32
    %c0_i32_1 = arith.constant 0 : i32
    return %c0_i32, %c0_i32_0 : i32, i32
  }
  func.func @transform_3(%arg0: i32) -> (i32, i32) {
    %c0_i32 = arith.constant 0 : i32
    %c0_i32_0 = arith.constant 0 : i32
    %c0_i32_1 = arith.constant 0 : i32
    return %c0_i32, %c0_i32_0 : i32, i32
  }
  func.func @transform_4(%arg0: i32) -> (i32, i32, i32) {
    %c0_i32 = arith.constant 0 : i32
    %c0_i32_0 = arith.constant 0 : i32
    %c0_i32_1 = arith.constant 0 : i32
    return %arg0, %c0_i32, %c0_i32_0 : i32, i32, i32
  }
}

</mosaic_0001>

<bundles_post_ra>
// kernel: tpu_custom_call.1
= control target key start
LH: loop header
LB: loop body
LE: loop exit
PB: predicated region body
PF: predicated region fallthrough
CT: control target
= control target key end

     0   :  { %9 = vsyncpa [#allocation4], 0  ;;  %s1173_s0 = inlined_call_operand.hbm [shape: f32[2,4,290], index: 0, kind: input, shape index: {}]   ;;  %s1174_s1 = inlined_call_operand.hbm [shape: f32[2,256], index: 1, kind: input, shape index: {}]   ;;  %s1175_s2 = inlined_call_operand.vmem [shape: f32[16,36], index: 2, kind: input, shape index: {}]   ;;  %s1176_s3 = inlined_call_operand.vmem [shape: f32[16,1], index: 3, kind: input, shape index: {}]   ;;  %s1177_s4 = inlined_call_operand.hbm [shape: f32[2,16,256], index: 4, kind: output, shape index: {}]  }
   0x1   :  { %11 = vsyncpa [#allocation4 + $0x1], 0 }
   0x2   :  { %12 = vsyncpa [#allocation7], 0 }
   0x3   :  { %13 = vsyncpa [#allocation5], 0 }
   0x4   :  { %15 = vsyncpa [#allocation5 + $0x1], 0  ;;  %s979_s15 = smov 0   ;;  %s981_s16 = smov 0  }
   0x5   :  { %s983_s17 = smov 0   ;;  %s985_s18 = smov 0  }
   0x6 LB: > { %s1000_s19 = sadd.s32 4294967295, %s936_s18   ;;  %s699_s20 = sadd.s32 4294967294, %s936_s18   ;;  %s936_s18 = sphi %s985_s18, %s1187_s18   ;;  %s932_s17 = sphi %s983_s17, %s1186_s17   ;;  %s928_s16 = sphi %s981_s16, %s1185_s16   ;;  %s924_s15 = sphi %s979_s15, %s1184_s15  }
   0x7   : > { %p41_p0 = scmp.ne.s32.totalorder %s928_s16, %s924_s15  ;;  %p42_p1 = scmp.eq.s32.totalorder %s1000_s19, 0 }
   0x8   : > { %p128_p2 = scmp.eq.s32.totalorder %s1000_s19, 1  ;;  %p134_p3 = scmp.eq.s32.totalorder %s699_s20, 1 }
   0x9   : > { %p1009_p4 = por %p42_p1, %p41_p0  ;;  %p700_p5 = scmp.ge.s32.totalorder %s936_s18, 1 }
   0xa   : > { %p1014_p6 = por %p134_p3, %p41_p0  ;;  %p141_p7 = scmp.lt.s32.totalorder %s936_s18, 3 }
   0xb   : > { %s153_s25 = sshll.u32 %s1174_s1, 4  ;;  %s938_s27 = smov [#allocation6]   ;;  %s154_s25 = int_to_ptr.hbm [resolvable:$true] %s153_s25 }
   0xc   : > { %p1022_p8 = pnand %p700_p5, %p141_p7  ;;  %s155_s28 = sshll.u32 %s938_s27, 4  ;;  %s156_s28 = int_to_ptr.vmem [resolvable:$true] %s155_s28 }
   0xd   : > { %s1032_s29 = sadd.s32 1, %s936_s18   ;;  %s28_s30 = sadd.s32 1, %s932_s17 }
   0xe   : > { %p740_p10 = pneg %p1022_p8  ;;  %s25_s5 = ssub.s32 %s936_s18, %s1032_s29 }
   0xf   : > { %p26_p12 = scmp.eq.s32.totalorder %s25_s5, 0  ;;  %p35_p13 = scmp.ne.s32.totalorder %s932_s17, %s928_s16 }
  0x10   : > { %p741_p11 = pnand %p740_p10, %p42_p1  ;;  %p36_p0 = scmp.eq.s32.totalorder %s936_s18, 0 }
  0x11   : > { %p753_p3 = scmp.lt.s32.totalorder %s936_s18, 2  ;;  %p1046_p7 = por %p128_p2, %p35_p13 }
  0x12   : > { %743 = dma.hbm_to_vmem [thread:$0]  (!%p741_p11), %s154_s25, 64, %s156_s28, [#allocation7]  }
  0x13   : > { %s1042_s6 = scalar_select %p26_p12, %s932_s17, %s28_s30  }
  0x14   : > { %p37_p5 = por %p36_p0, %p35_p13  ;;  %s172_s8 = sand.u32 1, %s932_s17  }
  0x15   : > { %s730_s9 = smul.u32 12, %s936_s18  ;;  %s173_s25 = scalar_lea.sflag [#allocation4], %s172_s8 }
  0x16   : > { %s729_s10 = smul.u32 12, %s172_s8  ;;  %p1055_p10 = pnand %p753_p3, %p37_p5 }
  0x17   : > { %s181_s13 = scalar_lea.hbm %s1173_s0, %s730_s9  ;;  %s843_s9 = scalar_lea.hbm %s1173_s0, 24 }
  0x18   : > { %s183_s20 = sshll.u32 %s181_s13, 4  ;;  %s176_s23 = scalar_lea.vmem [#allocation3], %s729_s10  ;;  %s184_s20 = int_to_ptr.hbm [resolvable:$true] %s183_s20 }
  0x19   : > { %s185_s24 = sshll.u32 %s176_s23, 4  ;;  %s836_s27 = sshra.s32 %s184_s20, 4  ;;  %s186_s24 = int_to_ptr.vmem [resolvable:$true] %s185_s24  ;;  %s837_s27 = int_to_ptr.hbm [resolvable:$true] %s836_s27 }
  0x1a   : > { %s838_s28 = scalar_lea.hbm %s837_s27, 12  ;;  %p840_p11 = pneg %p1055_p10 }
  0x1b   : > { %p839_p2 = scmp.ne.s32.totalorder %s837_s27, %s838_s28  ;;  %p844_p0 = scmp.lt.s32.totalorder %s837_s27, %s1173_s0 }
  0x1c   : > { %p845_p3 = scmp.lt.s32.totalorder %s843_s9, %s838_s28 }
  0x1d   : > { %p841_p12 = pnand %p840_p11, %p839_p2 }
  0x1e   : > { %p846_p5 = por %p845_p3, %p844_p0 }
  0x1f   : > { %p842_p13 = pneg %p841_p12 }
  0x21   : > { %p847_p9 = pnand %p846_p5, %p842_p13 }
  0x23   : > { %850 = shalt.err (!%p847_p9)
}
  0x24   : > { %747 = dma.hbm_to_vmem [thread:$0]  (!%p1055_p10), %s184_s20, 192, %s186_s24, %s173_s25  }
  0x25   : > { %194 = sbr.rel (%p1022_p8) target bundleno = 502 (0x1f6), region = 36  ;;  %s1072_s8 = sand.u32 (!%p1022_p8), 1, %s928_s16  }
  0x26   : > { %s731_s10 = smul.u32 (!%p1022_p8), 12, %s1072_s8  ;;  %s197_s13 = scalar_lea.sflag (!%p1022_p8), [#allocation4], %s1072_s8 }
  0x28   : > { %s1076_s23 = scalar_lea.vmem (!%p1022_p8), [#allocation3], %s731_s10 }
  0x2a   : > { %911 = dma.done.wait (%p1009_p4), %s197_s13, 192  }
  0x2b   : > { %913 = vsyncadd (%p1009_p4), %s197_s13, 4294967104 }
  0x2c   : > { %915 = dma.done.wait (%p42_p1), [#allocation7], 64  }
  0x2d   : > { %917 = vsyncadd (%p42_p1), [#allocation7], 4294967232  ;;  %v276_v0 = vld [vmem:[#allocation6 + $0x1] ss:$2 sm:$0x3]  ;;  %vm237_vm0 = vcmask 1043456  }
  0x2e   : > { %v314_v1 = vld [vmem:[#allocation6] ss:$2 sm:$0x3]  ;;  %v278_v2 = vperm.slane %v276_v0, 0  ;;  %v279_v3 = vperm.slane %v276_v0, 1  ;;  %s939_s21 = smov 2  }
  0x2f   : > { %v376_v4 = vld [vmem:[#allocation6 + $0x1] ss:$2 sm:$0x3]  ;;  %v415_v5 = vld [vmem:[#allocation6] ss:$2 sm:$0x3] }
  0x30   : > { %v280_v6 = vrot.slane %v279_v3, 4  ;;  %v317_v7 = vperm.slane %v314_v1, 1  ;;  %v378_v8 = vperm.slane %v376_v4, 0  ;;  %v379_v9 = vperm.slane %v376_v4, 1  ;;  %s940_s26 = smov 18   ;;  %s941_s14 = smov 34  }
  0x31   : > { %v477_v10 = vld [vmem:[#allocation6 + $0x1] ss:$2 sm:$0x3]  ;;  %v418_v13 = vperm.slane %v415_v5, 1  ;;  %v316_v16 = vperm.slane %v314_v1, 0  ;;  %v417_v20 = vperm.slane %v415_v5, 0 }
  0x32   : > { %v281_v11 = vsel %vm237_vm0, %v278_v2, %v280_v6  ;;  %v380_v12 = vrot.slane %v379_v9, 4  ;;  %v479_v14 = vperm.slane %v477_v10, 0  ;;  %v480_v15 = vperm.slane %v477_v10, 1  ;;  %s942_s20 = smov 16   ;;  %s943_s24 = smov 32   ;;  %v1093_v29 = vld [vmem:[%s1076_s23] sm:$0xff] }
  0x33   : > { %282 = vrot.lane.b32.xlu0 %v281_v11, %s939_s21  ;;  %v318_v17 = vrot.slane %v317_v7, 4  ;;  %v419_v21 = vrot.slane %v418_v13, 4  ;;  %v232_v25 = vld [vmem:[#allocation6] ss:$2 sm:$0x3]  ;;  %vm285_vm1 = vcmask 15360  }
  0x34   : > { %v381_v18 = vsel %vm237_vm0, %v378_v8, %v380_v12  ;;  %v481_v19 = vrot.slane %v480_v15, 4  ;;  %v235_v26 = vperm.slane %v232_v25, 1  ;;  %v234_v27 = vperm.slane %v232_v25, 0  ;;  %v250_v32 = vld [vmem:[%s1076_s23 + $0x8] sm:$0xf]  ;;  %s944_s25 = smov 126  }
  0x35   : > { %382 = vrot.lane.b32.xlu1 %v381_v18, %s940_s26  ;;  %v319_v23 = vsel %vm237_vm0, %v316_v16, %v318_v17  ;;  %v420_v24 = vsel %vm237_vm0, %v417_v20, %v419_v21  ;;  %256 = vst [vmem:[#allocation1 + $0x11] ss:$2 sm:$0xff] %v250_v32  ;;  %v274_v36 = vld [vmem:[%s1076_s23 + $0x8] sm:$0xf]  ;;  %vm323_vm2 = vcmask 130048   ;;  %s945_s27 = smov 112  }
  0x36   : > { %v482_v22 = vsel %vm237_vm0, %v479_v14, %v481_v19  ;;  %v236_v28 = vrot.slane %v235_v26, 4  ;;  %v313_v44 = vld [vmem:[%s1076_s23 + $0x8] sm:$0xf]  ;;  %vm385_vm3 = vcmask 146432   ;;  %s946_s28 = smov 111   ;;  %vm424_vm4 = vcmask 261120  }
  0x37   : > { %483 = vrot.lane.b32.xlu2 %v482_v22, %s941_s14  ;;  %v352_v54 = vld [vmem:[%s1076_s23 + $0x8] sm:$0xf]  ;;  %s947_s30 = smov 110   ;;  %s948_s5 = smov 96   ;;  %vm486_vm5 = vcmask 277504   ;;  %vm305_vm6 = vcmask 1031168  }
  0x38   : > { %v238_v30 = vsel %vm237_vm0, %v234_v27, %v236_v28  ;;  %v375_v56 = vld [vmem:[%s1076_s23 + $0x8] sm:$0xf]  ;;  %s949_s9 = smov 95   ;;  %s950_s11 = smov 94   ;;  %vm344_vm7 = vcmask 916480   ;;  %vm367_vm8 = vcmask 908288  }
  0x39   : > { %v240_v31 = vmul.f32 %v238_v30, %v1093_v29  ;;  %v414_v1 = vld [vmem:[%s1076_s23 + $0x8] sm:$0xf]  ;;  %s951_s12 = smov 127   ;;  %vm406_vm9 = vcmask 900096   ;;  %vm444_vm10 = vcmask 785408   ;;  %vm468_vm11 = vcmask 777216  }
  0x3a   : > { %v452_v11 = vld [vmem:[%s1076_s23 + $0x8] sm:$0xf]  ;;  %vm506_vm12 = vcmask 769024   ;;  %vm266_vm13 = vcmask 1039360   ;;  %vm537_vm14 = vcmask 293888   ;;  %s886_s14 = scalar_lea.hbm %s1177_s4, 64 }
  0x3b   : > { %320 = vrot.lane.b32.xlu0 %v319_v23, %s942_s20  ;;  %242 = vst [vmem:[#allocation1] ss:$2 sm:$0xff] %v240_v31  ;;  %v476_v14 = vld [vmem:[%s1076_s23 + $0x8] sm:$0xf] }
  0x3c   : > { %v1100_v38 = vld.sshfl [vmem:[#allocation1 + $0x10] sm:$0xff pattern:$0x75316420] }
  0x3d   : > { %421 = vrot.lane.b32.xlu1 %v420_v24, %s943_s24 }
  0x42   : > { %v243_v33 = vld.sshfl [vmem:[#allocation1] sm:$0xff pattern:$0x75316420]  ;;  %v244_v34 = vld.sshfl [vmem:[#allocation1 + $0x8] sm:$0xff pattern:$0x75316420] }
  0x43   : > { %254 = vst [vmem:[#allocation1 + $0x1] ss:$2 sm:$0xff] %v1093_v29 }
  0x44   : > { %247 = vst [vmem:[#allocation2 + $0x30] sm:$0xf] %v243_v33 }
  0x45   : > { %248 = vst [vmem:[#allocation2] sm:$0xf] %v244_v34 }
  0x4a   : > { %v1102_v39 = vld.sshfl [vmem:[#allocation1] sm:$0xff pattern:$0x75316420]  ;;  %v1104_v40 = vld.sshfl [vmem:[#allocation1 + $0x8] sm:$0xff pattern:$0x75316420] }
  0x91   : > { %v484_v12 = vpop.permute.xlu2 %483 }
  0x92   : > { %v485_v15 = vrot.slane %v484_v12, 4 }
  0x94   : > { %v491_v18 = vmul.f32 %v485_v15, %v476_v14  ;;  %v487_v19 = vsel %vm486_vm5, %v485_v15, %v484_v12 }
  0x95   : > { %v490_v21 = vmul.f32 %v487_v19, %v1093_v29 }
  0xa5   : > { %v283_v35 = vpop.permute.xlu0 %282 }
  0xa6   : > { %v284_v37 = vrot.slane %v283_v35, 4 }
  0xa7   : > { %v383_v53 = vpop.permute.xlu1 %382 }
  0xa8   : > { %v286_v41 = vsel %vm285_vm1, %v284_v37, %v283_v35  ;;  %v290_v42 = vmul.f32 %v284_v37, %v274_v36  ;;  %v384_v57 = vrot.slane %v383_v53, 4 }
  0xa9   : > { %v289_v43 = vmul.f32 %v286_v41, %v1093_v29 }
  0xaa   : > { %295 = vst [vmem:[#allocation1 + $0x10] ss:$2 sm:$0xff] %v290_v42  ;;  %v390_v60 = vmul.f32 %v384_v57, %v375_v56  ;;  %v386_v61 = vsel %vm385_vm3, %v384_v57, %v383_v53  ;;  %v952_v56 = vmov 0  }
  0xab   : > { %293 = vst [vmem:[#allocation1] ss:$2 sm:$0xff] %v289_v43  ;;  %v389_v0 = vmul.f32 %v386_v61, %v1093_v29  ;;  %805 = vset.pattern.permute.xlu0 %v952_v56  ;;  %804 = vset.pattern.permute.xlu2 %v952_v56 }
  0xad   : > { %v321_v45 = vpop.permute.xlu0 %320 }
  0xae   : > { %v322_v46 = vrot.slane %v321_v45, 4 }
  0xaf   : > { %v422_v62 = vpop.permute.xlu1 %421 }
  0xb0   : > { %v324_v47 = vsel %vm323_vm2, %v322_v46, %v321_v45  ;;  %v328_v48 = vmul.f32 %v322_v46, %v313_v44  ;;  %v423_v2 = vrot.slane %v422_v62, 4 }
  0xb1   : > { %v327_v49 = vmul.f32 %v324_v47, %v1093_v29  ;;  %v298_v50 = vld.sshfl [vmem:[#allocation1 + $0x10] sm:$0xff pattern:$0x75316420] }
  0xb2   : > { %303 = vrot.lane.b32.xlu1 %v298_v50, %s944_s25  ;;  %334 = vst [vmem:[#allocation1 + $0x11] ss:$2 sm:$0xff] %v328_v48  ;;  %v297_v51 = vld.sshfl [vmem:[#allocation1 + $0x8] sm:$0xff pattern:$0x75316420]  ;;  %v429_v5 = vmul.f32 %v423_v2, %v414_v1  ;;  %v425_v6 = vsel %vm424_vm4, %v423_v2, %v422_v62 }
  0xb3   : > { %301 = vrot.lane.b32.xlu0 %v297_v51, %s944_s25  ;;  %v296_v52 = vld.sshfl [vmem:[#allocation1] sm:$0xff pattern:$0x75316420]  ;;  %v428_v8 = vmul.f32 %v425_v6, %v1093_v29 }
  0xb4   : > { %299 = vrot.lane.b32.xlu2 %v296_v52, %s944_s25  ;;  %332 = vst [vmem:[#allocation1 + $0x1] ss:$2 sm:$0xff] %v327_v49 }
  0xb9   : > { %v337_v55 = vld.sshfl [vmem:[#allocation1 + $0x10] sm:$0xff pattern:$0x75316420] }
  0xba   : > { %342 = vrot.lane.b32.xlu1 %v337_v55, %s945_s27  ;;  %357 = vst [vmem:[#allocation1 + $0x10] ss:$2 sm:$0xff] %v352_v54  ;;  %v526_v54 = vld [vmem:[%s1176_s3 + $0x8] sm:$0xff]  ;;  %v525_v55 = vld [vmem:[%s1176_s3] sm:$0xff] }
  0xbb   : > { %v336_v58 = vld.sshfl [vmem:[#allocation1 + $0x8] sm:$0xff pattern:$0x75316420]  ;;  %v335_v59 = vld.sshfl [vmem:[#allocation1] sm:$0xff pattern:$0x75316420] }
  0xbc   : > { %340 = vrot.lane.b32.xlu0 %v336_v58, %s945_s27  ;;  %338 = vrot.lane.b32.xlu2 %v335_v59, %s945_s27  ;;  %355 = vst [vmem:[#allocation1] ss:$2 sm:$0xff] %v1093_v29  ;;  %s706_s27 = sshll.u32 %s1072_s8, 5 }
  0xc1   : > { %v360_v63 = vld.sshfl [vmem:[#allocation1 + $0x10] sm:$0xff pattern:$0x75316420] }
  0xc2   : > { %365 = vrot.lane.b32.xlu1 %v360_v63, %s946_s28  ;;  %396 = vst [vmem:[#allocation1 + $0x11] ss:$2 sm:$0xff] %v390_v60 }
  0xc3   : > { %v359_v3 = vld.sshfl [vmem:[#allocation1 + $0x8] sm:$0xff pattern:$0x75316420]  ;;  %v358_v4 = vld.sshfl [vmem:[#allocation1] sm:$0xff pattern:$0x75316420] }
  0xc4   : > { %363 = vrot.lane.b32.xlu0 %v359_v3, %s946_s28  ;;  %361 = vrot.lane.b32.xlu2 %v358_v4, %s946_s28  ;;  %394 = vst [vmem:[#allocation1 + $0x1] ss:$2 sm:$0xff] %v389_v0  ;;  %s718_s28 = sshll.u32 %s1000_s19, 5  ;;  %s601_s19 = scalar_lea.sflag [#allocation5], %s1072_s8 }
  0xc9   : > { %v399_v7 = vld.sshfl [vmem:[#allocation1 + $0x10] sm:$0xff pattern:$0x75316420] }
  0xca   : > { %404 = vrot.lane.b32.xlu1 %v399_v7, %s947_s30  ;;  %434 = vst [vmem:[#allocation1 + $0x10] ss:$2 sm:$0xff] %v429_v5 }
  0xcb   : > { %v398_v9 = vld.sshfl [vmem:[#allocation1 + $0x8] sm:$0xff pattern:$0x75316420]  ;;  %v397_v10 = vld.sshfl [vmem:[#allocation1] sm:$0xff pattern:$0x75316420] }
  0xcc   : > { %402 = vrot.lane.b32.xlu0 %v398_v9, %s947_s30  ;;  %400 = vrot.lane.b32.xlu2 %v397_v10, %s947_s30  ;;  %432 = vst [vmem:[#allocation1] ss:$2 sm:$0xff] %v428_v8 }
  0xd1   : > { %v437_v13 = vld.sshfl [vmem:[#allocation1 + $0x10] sm:$0xff pattern:$0x75316420] }
  0xd2   : > { %442 = vrot.lane.b32.xlu1 %v437_v13, %s948_s5  ;;  %458 = vst [vmem:[#allocation1 + $0x11] ss:$2 sm:$0xff] %v452_v11 }
  0xd3   : > { %v436_v16 = vld.sshfl [vmem:[#allocation1 + $0x8] sm:$0xff pattern:$0x75316420]  ;;  %v435_v17 = vld.sshfl [vmem:[#allocation1] sm:$0xff pattern:$0x75316420] }
  0xd4   : > { %440 = vrot.lane.b32.xlu0 %v436_v16, %s948_s5  ;;  %438 = vrot.lane.b32.xlu2 %v435_v17, %s948_s5  ;;  %456 = vst [vmem:[#allocation1 + $0x1] ss:$2 sm:$0xff] %v1093_v29  ;;  %v514_v16 = vld [vmem:[%s1175_s2 + $0x8] sm:$0xff]  ;;  %v513_v17 = vld [vmem:[%s1175_s2] sm:$0xff] }
  0xd9   : > { %v461_v20 = vld.sshfl [vmem:[#allocation1 + $0x10] sm:$0xff pattern:$0x75316420] }
  0xda   : > { %466 = vrot.lane.b32.xlu1 %v461_v20, %s949_s9  ;;  %496 = vst [vmem:[#allocation1 + $0x10] ss:$2 sm:$0xff] %v491_v18 }
  0xdb   : > { %v460_v22 = vld.sshfl [vmem:[#allocation1 + $0x8] sm:$0xff pattern:$0x75316420]  ;;  %v459_v23 = vld.sshfl [vmem:[#allocation1] sm:$0xff pattern:$0x75316420] }
  0xdc   : > { %464 = vrot.lane.b32.xlu0 %v460_v22, %s949_s9  ;;  %462 = vrot.lane.b32.xlu2 %v459_v23, %s949_s9  ;;  %494 = vst [vmem:[#allocation1] ss:$2 sm:$0xff] %v490_v21  ;;  %s612_s9 = scalar_lea.hbm %s1177_s4, %s718_s28 }
  0xdd   : > { %s615_s10 = sshll.u32 %s612_s9, 4  ;;  %s616_s10 = int_to_ptr.hbm [resolvable:$true] %s615_s10 }
  0xde   : > { %s880_s13 = sshra.s32 %s616_s10, 4  ;;  %s881_s13 = int_to_ptr.hbm [resolvable:$true] %s880_s13 }
  0xdf   : > { %s882_s23 = scalar_lea.hbm %s881_s13, 32  ;;  %p887_p9 = scmp.lt.s32.totalorder %s881_s13, %s1177_s4 }
  0xe0   : > { %p883_p1 = scmp.ne.s32.totalorder %s881_s13, %s882_s23  ;;  %p888_p10 = scmp.lt.s32.totalorder %s886_s14, %s882_s23 }
  0xe1   : > { %v499_v24 = vld.sshfl [vmem:[#allocation1 + $0x10] sm:$0xff pattern:$0x75316420] }
  0xe2   : > { %504 = vrot.lane.b32.xlu1 %v499_v24, %s950_s11  ;;  %p884_p4 = pnand %p883_p1, %p1046_p7  ;;  %p889_p2 = por %p888_p10, %p887_p9 }
  0xe3   : > { %v498_v25 = vld.sshfl [vmem:[#allocation1 + $0x8] sm:$0xff pattern:$0x75316420]  ;;  %v497_v26 = vld.sshfl [vmem:[#allocation1] sm:$0xff pattern:$0x75316420] }
  0xe4   : > { %502 = vrot.lane.b32.xlu0 %v498_v25, %s950_s11  ;;  %500 = vrot.lane.b32.xlu2 %v497_v26, %s950_s11  ;;  %s230_s11 = scalar_lea.vmem [#allocation8], %s706_s27  ;;  %p885_p8 = pneg %p884_p4 }
  0xe6   : > { %p890_p11 = pnand %p889_p2, %p885_p8 }
  0xea   : > { %264 = vrot.lane.b32.xlu1 %v1100_v38, %s951_s12 }
  0xec   : > { %262 = vrot.lane.b32.xlu0 %v1104_v40, %s951_s12  ;;  %260 = vrot.lane.b32.xlu2 %v1102_v39, %s951_s12  ;;  %s613_s12 = sshll.u32 %s230_s11, 4  ;;  %s614_s12 = int_to_ptr.vmem [resolvable:$true] %s613_s12 }
  0xf4   : > { %534 = vperm.xlu0 %805, %v526_v54   ;;  %529 = vperm.xlu2 %804, %v525_v55  }
 0x10e   : > { %v300_v27 = vpop.permute.xlu2 %299 }
 0x116   : > { %v339_v28 = vpop.permute.xlu2 %338 }
 0x11e   : > { %v362_v33 = vpop.permute.xlu2 %361 }
 0x124   : > { %v304_v29 = vpop.permute.xlu1 %303 }
 0x125   : > { %v302_v30 = vpop.permute.xlu0 %301 }
 0x126   : > { %v306_v31 = vsel %vm305_vm6, %v300_v27, %v302_v30  ;;  %v307_v32 = vsel %vm305_vm6, %v302_v30, %v304_v29  ;;  %v401_v39 = vpop.permute.xlu2 %400 }
 0x127   : > { %310 = vst [vmem:[#allocation2 + $0x18] sm:$0xf] %v306_v31 }
 0x128   : > { %311 = vst [vmem:[#allocation2 + $0x10] sm:$0xf] %v307_v32 }
 0x12c   : > { %v343_v34 = vpop.permute.xlu1 %342 }
 0x12e   : > { %v341_v35 = vpop.permute.xlu0 %340  ;;  %v439_v47 = vpop.permute.xlu2 %438 }
 0x12f   : > { %v345_v36 = vsel %vm344_vm7, %v339_v28, %v341_v35  ;;  %v346_v37 = vsel %vm344_vm7, %v341_v35, %v343_v34 }
 0x130   : > { %349 = vst [vmem:[#allocation2 + $0x18] sm:$0xf0] %v345_v36 }
 0x131   : > { %350 = vst [vmem:[#allocation2 + $0x10] sm:$0xf0] %v346_v37 }
 0x134   : > { %v366_v38 = vpop.permute.xlu1 %365 }
 0x136   : > { %v364_v40 = vpop.permute.xlu0 %363  ;;  %v463_v52 = vpop.permute.xlu2 %462 }
 0x137   : > { %v368_v41 = vsel %vm367_vm8, %v362_v33, %v364_v40  ;;  %v369_v42 = vsel %vm367_vm8, %v364_v40, %v366_v38  ;;  %v517_v12 = vld [vmem:[#allocation2 + $0x18] sm:$0xff] }
 0x138   : > { %372 = vst [vmem:[#allocation2 + $0x48] sm:$0xf] %v368_v41  ;;  %v518_v13 = vld [vmem:[#allocation2 + $0x10] sm:$0xff] }
 0x139   : > { %373 = vst [vmem:[#allocation2 + $0x28] sm:$0xf] %v369_v42 }
 0x13c   : > { %v405_v43 = vpop.permute.xlu1 %404 }
 0x13e   : > { %v403_v44 = vpop.permute.xlu0 %402  ;;  %v501_v60 = vpop.permute.xlu2 %500 }
 0x13f   : > { %v407_v45 = vsel %vm406_vm9, %v401_v39, %v403_v44  ;;  %v408_v46 = vsel %vm406_vm9, %v403_v44, %v405_v43 }
 0x140   : > { %411 = vst [vmem:[#allocation2 + $0x48] sm:$0xf0] %v407_v45 }
 0x141   : > { %412 = vst [vmem:[#allocation2 + $0x28] sm:$0xf0] %v408_v46 }
 0x144   : > { %v443_v48 = vpop.permute.xlu1 %442 }
 0x146   : > { %v441_v49 = vpop.permute.xlu0 %440  ;;  %v261_v2 = vpop.permute.xlu2 %260 }
 0x147   : > { %v445_v50 = vsel %vm444_vm10, %v439_v47, %v441_v49  ;;  %v446_v51 = vsel %vm444_vm10, %v441_v49, %v443_v48  ;;  %v519_v10 = vld [vmem:[#allocation2 + $0x48] sm:$0xff] }
 0x148   : > { %449 = vst [vmem:[#allocation2 + $0x8] sm:$0xf] %v445_v50  ;;  %v520_v11 = vld [vmem:[#allocation2 + $0x28] sm:$0xff] }
 0x149   : > { %450 = vst [vmem:[#allocation2 + $0x20] sm:$0xf] %v446_v51 }
 0x14c   : > { %v467_v53 = vpop.permute.xlu1 %466 }
 0x14e   : > { %v465_v57 = vpop.permute.xlu0 %464  ;;  %v530_v18 = vpop.permute.xlu2 %529 }
 0x14f   : > { %v469_v58 = vsel %vm468_vm11, %v463_v52, %v465_v57  ;;  %v470_v59 = vsel %vm468_vm11, %v465_v57, %v467_v53 }
 0x150   : > { %473 = vst [vmem:[#allocation2 + $0x8] sm:$0xf0] %v469_v58 }
 0x151   : > { %474 = vst [vmem:[#allocation2 + $0x20] sm:$0xf0] %v470_v59 }
 0x154   : > { %v505_v61 = vpop.permute.xlu1 %504 }
 0x156   : > { %v503_v62 = vpop.permute.xlu0 %502 }
 0x157   : > { %v507_v63 = vsel %vm506_vm12, %v501_v60, %v503_v62  ;;  %v508_v0 = vsel %vm506_vm12, %v503_v62, %v505_v61  ;;  %v521_v8 = vld [vmem:[#allocation2 + $0x8] sm:$0xff] }
 0x158   : > { %511 = vst [vmem:[#allocation2 + $0x40] sm:$0xf] %v507_v63  ;;  %v522_v9 = vld [vmem:[#allocation2 + $0x20] sm:$0xff] }
 0x159   : > { %512 = vst [vmem:[#allocation2 + $0x38] sm:$0xf] %v508_v0 }
 0x15c   : > { %v265_v1 = vpop.permute.xlu1 %264 }
 0x15e   : > { %v263_v3 = vpop.permute.xlu0 %262 }
 0x15f   : > { %v268_v4 = vsel %vm266_vm13, %v263_v3, %v265_v1  ;;  %v267_v5 = vsel %vm266_vm13, %v261_v2, %v263_v3  ;;  %v523_v6 = vld [vmem:[#allocation2 + $0x40] sm:$0xf] }
 0x160   : > { %272 = vst [vmem:[#allocation2] sm:$0xf0] %v268_v4  ;;  %707 = vmatpush.msk.msra.mxu0 %vm237_vm0, %v523_v6  ;;  %719 = vmatpush.msk.msra.mxu2 %vm237_vm0, %v523_v6  ;;  %v524_v7 = vld [vmem:[#allocation2 + $0x38] sm:$0xf] }
 0x161   : > { %271 = vst [vmem:[#allocation2 + $0x30] sm:$0xf0] %v267_v5  ;;  %710 = vmatpush.msk.msra.mxu1 %vm237_vm0, %v524_v7  ;;  %724 = vmatpush.msk.msra.mxu3 %vm237_vm0, %v524_v7 }
 0x162   : > { %562 = vmatpush.msra.mxu0 %v521_v8  ;;  %720 = vmatpush.msra.mxu2 %v521_v8 }
 0x163   : > { %585 = vmatpush.msra.mxu1 %v522_v9  ;;  %725 = vmatpush.msra.mxu3 %v522_v9 }
 0x164   : > { %563 = vmatpush.msra.mxu0 %v519_v10  ;;  %721 = vmatpush.msra.mxu2 %v519_v10 }
 0x165   : > { %586 = vmatpush.msra.mxu1 %v520_v11  ;;  %726 = vmatpush.msra.mxu3 %v520_v11 }
 0x166   : > { %564 = vmatpush.msra.mxu0 %v517_v12  ;;  %722 = vmatpush.msra.mxu2 %v517_v12  ;;  %v535_v23 = vpop.permute.xlu0 %534 }
 0x167   : > { %587 = vmatpush.msra.mxu1 %v518_v13  ;;  %727 = vmatpush.msra.mxu3 %v518_v13  ;;  %v516_v14 = vld [vmem:[#allocation2] sm:$0xff] }
 0x168   : > { %v515_v15 = vld [vmem:[#allocation2 + $0x30] sm:$0xff] }
 0x169   : > { %565 = vmatpush.msra.mxu0 %v515_v15  ;;  %723 = vmatpush.msra.mxu2 %v515_v15 }
 0x16a   : > { %588 = vmatpush.msra.mxu1 %v516_v14  ;;  %728 = vmatpush.msra.mxu3 %v516_v14 }
 0x16b   : > { %709 = vmatmul.msk.f32.vlgmr.msra.gmra.mxu2 %vm537_vm14, %v514_v16  ;;  %712 = vmatmul.msk.f32.vlgmr.msra.gmra.mxu3 %vm537_vm14, %v514_v16 }
 0x16c   : > { %708 = vmatmul.msk.f32.vlgmr.msra.gmra.mxu0 %vm537_vm14, %v513_v17  ;;  %711 = vmatmul.msk.f32.vlgmr.msra.gmra.mxu1 %vm537_vm14, %v513_v17 }
 0x1e9   : > { %v590_v19 = vpop.f32.mrf.mxu1  ;;  %v567_v20 = vpop.f32.mrf.mxu0 }
 0x1ea   : > { %v591_v21 = vadd.f32 %v590_v19, %v530_v18  ;;  %v568_v22 = vadd.f32 %v567_v20, %v530_v18 }
 0x1ec   : > { %597 = vst [vmem:[%s230_s11 + $0x8] sm:$0xff] %v591_v21 }
 0x1ed   : > { %596 = vst [vmem:[%s230_s11] sm:$0xff] %v568_v22 }
 0x1ee   : > { %v593_v24 = vpop.f32.mrf.mxu3  ;;  %v570_v25 = vpop.f32.mrf.mxu2 }
 0x1ef   : > { %v594_v26 = vadd.f32 %v593_v24, %v535_v23  ;;  %v571_v27 = vadd.f32 %v570_v25, %v535_v23 }
 0x1f1   : > { %599 = vst [vmem:[%s230_s11 + $0x18] sm:$0xff] %v594_v26 }
 0x1f2   : > { %598 = vst [vmem:[%s230_s11 + $0x10] sm:$0xff] %v571_v27 }
 0x1f3   : > { %893 = shalt.err (!%p890_p11)
}
 0x1f4   : > { %s953_s8 = smov 256  }
 0x1f5   : > { %738 = dma.vmem_to_hbm [thread:$0]  (%p1046_p7), %s614_s12, 512, %s616_s10, %s601_s19, %s953_s8, %s953_s8, %s942_s20  }
 0x1f6 PF: > { %s630_s27 = sand.u32 1, %s924_s15   ;;  %p1183_p12 = scmp.ge.s32.totalorder %s936_s18, 2 }
 0x1f7   : > { %s631_s28 = scalar_lea.sflag [#allocation5], %s630_s27 }
 0x1f8   : > { %p749_p13 = pnand %p1183_p12, %p1014_p6 }
 0x1fa   : > { %p750_p0 = pneg %p749_p13 }
 0x1fc   : > { %919 = dma.done.wait (%p750_p0), %s631_s28, 512  }
 0x1fd   : > { %921 = vsyncadd (%p750_p0), %s631_s28, 4294966784  ;;  %p18_p3 = scmp.ge.s32.totalorder %s1032_s29, 4   ;;  %s1184_s15 = smov %s928_s16 }
 0x1fe   : > { %s1185_s16 = smov %s932_s17  ;;  %s1186_s17 = smov %s1042_s6 }
 0x1ff   : > { %s1187_s18 = smov %s1032_s29  ;;  %20 = sbr.rel (!%p18_p3) target bundleno = 6 (0x6), region = 98 }
 0x204   :  { %637 = vsyncpa [#allocation4], 1 }
 0x205   :  { %639 = vsyncpa [#allocation4 + $0x1], 1 }
 0x206   :  { %640 = vsyncpa [#allocation7], 1 }
 0x207   :  { %641 = vsyncpa [#allocation5], 1 }
 0x208   :  { %643 = vsyncpa [#allocation5 + $0x1], 1 }

</bundles_post_ra>
